<compile_context>
chip_gen: v7x
topology: tpu7x:2x2x1
jax: 0.10.0
libtpu: 0.0.40
codegen_flags: <defaults>
</compile_context>

<pallas_src>
import jax
import jax.numpy as jnp
from jax.experimental import pallas as pl
from jax.experimental.pallas import tpu as pltpu

LANE = 128


def _round_up(x, m):
    return (x + m - 1) // m * m


# ----------------------------- Pallas kernels ------------------------------

def _conv_bn_relu_kernel(p_ref, w_ref, s_ref, b_ref, o_ref):
    """One M-tile of (im2col conv as matmul) -> folded-BN affine -> ReLU."""
    acc = jnp.dot(p_ref[...], w_ref[...], preferred_element_type=jnp.float32)
    o_ref[...] = jnp.maximum(acc * s_ref[...] + b_ref[...], 0.0).astype(o_ref.dtype)


def _block_pool_kernel(x_ref, w1_ref, s1_ref, b1_ref, w2_ref, s2_ref, b2_ref,
                       pooled_ref, x_scr, z_scr):
    """Fused BasicBlock + global-average-pool for one batch element.

    x_ref:      (1, Ho, Wo, C)  un-padded stem activations, bf16
    w1/w2:      (9, C, C)       per-tap 3x3 conv weights, bf16
    s*/b*:      (1, C)          folded BN scale / shift, f32
    pooled_ref: (1, 1, C)       f32 pooled features (FC runs in a separate kernel)
    x_scr:      (Hp, Wp8, C)    VMEM scratch: halo-padded input, Wp8 % 8 == 0
    z_scr:      (Hp, Wp8, C)    VMEM scratch: halo-padded conv1 activation
    """
    _, Ho, Wo, C = x_ref.shape
    Hp, Wp8, _ = x_scr.shape
    M = Ho * Wo

    zrow = jnp.zeros((1, Wp8, C), jnp.bfloat16)
    zcol_l = jnp.zeros((Ho, 1, C), jnp.bfloat16)
    zcol_r = jnp.zeros((Ho, Wp8 - Wo - 1, C), jnp.bfloat16)

    # Zero only the halo strips (the interior is fully overwritten every step).
    # Done unconditionally (not pl.program_id == 0) so it is safe if the batch
    # grid axis is sharded across TensorCores.
    x_scr[0:1, :, :] = zrow
    x_scr[Hp - 1:Hp, :, :] = zrow
    x_scr[1:1 + Ho, 0:1, :] = zcol_l
    x_scr[1:1 + Ho, 1 + Wo:Wp8, :] = zcol_r
    x_scr[1:1 + Ho, 1:1 + Wo, :] = x_ref[0]

    # --- conv1 (3x3 / s1) as 9 shifted matmuls, + BN + ReLU -----------------
    xp = x_scr[...]
    acc1 = jnp.zeros((M, C), jnp.float32)
    for t in range(9):
        ki, kj = divmod(t, 3)
        tap = xp[ki:ki + Ho, kj:kj + Wo, :].reshape(M, C)
        acc1 += jnp.dot(tap, w1_ref[t], preferred_element_type=jnp.float32)
    z = jnp.maximum(acc1 * s1_ref[...] + b1_ref[...], 0.0).astype(jnp.bfloat16)

    # re-pad conv1 output inside VMEM (halo strips only; no HBM round trip)
    z_scr[0:1, :, :] = zrow
    z_scr[Hp - 1:Hp, :, :] = zrow
    z_scr[1:1 + Ho, 0:1, :] = zcol_l
    z_scr[1:1 + Ho, 1 + Wo:Wp8, :] = zcol_r
    z_scr[1:1 + Ho, 1:1 + Wo, :] = z.reshape(Ho, Wo, C)

    # --- conv2 (3x3 / s1) + BN + residual + ReLU ----------------------------
    zp = z_scr[...]
    acc2 = jnp.zeros((M, C), jnp.float32)
    for t in range(9):
        ki, kj = divmod(t, 3)
        tap = zp[ki:ki + Ho, kj:kj + Wo, :].reshape(M, C)
        acc2 += jnp.dot(tap, w2_ref[t], preferred_element_type=jnp.float32)

    identity = x_ref[0].reshape(M, C).astype(jnp.float32)
    y2 = jnp.maximum(acc2 * s2_ref[...] + b2_ref[...] + identity, 0.0)

    # --- global average pool -------------------------------------------------
    pooled = jnp.sum(y2, axis=0, keepdims=True) * (1.0 / M)      # (1, C)
    pooled_ref[...] = pooled.reshape(1, 1, C)


def _fc_kernel(p_ref, w_ref, b_ref, o_ref):
    """Batched replaced final Linear: (N, C) x (C, NCLS) + bias."""
    o_ref[...] = (jnp.dot(p_ref[...], w_ref[...],
                          preferred_element_type=jnp.float32) + b_ref[...])


# ------------------------------ call wrappers -------------------------------

def conv_bn_relu(patches, w, scale, shift, *, tm=256, out_dtype=jnp.bfloat16):
    """Tiled (over M) im2col-conv + BN + ReLU.  Operands bf16, accumulate f32."""
    M, K = patches.shape
    C = w.shape[1]
    tm = min(tm, _round_up(M, 8))           # clamp for small problems
    Mp = _round_up(M, tm)
    if Mp != M:
        patches = jnp.pad(patches, ((0, Mp - M), (0, 0)))
    flops = 2 * Mp * K * C
    bytes_accessed = (Mp * K + K * C + Mp * C) * 2 + 2 * C * 4
    out = pl.pallas_call(
        _conv_bn_relu_kernel,
        out_shape=jax.ShapeDtypeStruct((Mp, C), out_dtype),
        grid=(Mp // tm,),
        in_specs=[pl.BlockSpec((tm, K), lambda i: (i, 0)),      # K full-extent (27)
                  pl.BlockSpec((K, C), lambda i: (0, 0)),       # weights stay resident
                  pl.BlockSpec((1, C), lambda i: (0, 0)),
                  pl.BlockSpec((1, C), lambda i: (0, 0))],
        out_specs=pl.BlockSpec((tm, C), lambda i: (i, 0)),
        compiler_params=pltpu.CompilerParams(
            dimension_semantics=("parallel",)),
        cost_estimate=pl.CostEstimate(flops=flops, transcendentals=0,
                                      bytes_accessed=bytes_accessed),
    )(patches, w, scale, shift)
    return out[:M]


def basic_block_pool(y0, w1, s1, b1, w2, s2, b2):
    """Fused BasicBlock + global-avg-pool.  Grid over batch; weights constant."""
    N, Ho, Wo, C = y0.shape
    Hp = Ho + 2
    Wp8 = _round_up(Wo + 2, 8)              # sublane-aligned halo width
    M = Ho * Wo

    flops = N * 2 * 9 * 2 * M * C * C
    bytes_accessed = (N * Ho * Wo * C * 2 + 2 * 9 * C * C * 2 + 4 * C * 4
                      + N * C * 4)
    vmem_need = (2 * Ho * Wo * C * 2            # double-buffered input block
                 + 2 * Hp * Wp8 * C * 2         # two bf16 halo scratches
                 + 2 * (2 * 9 * C * C * 2 + 4 * C * 4)   # weights + BN (2x buffered)
                 + 2 * C * 4                    # output block
                 + 8 * M * C * 4)               # f32 temporaries (acc, taps, y2)
    vmem_limit = int(min(64 * 1024 * 1024, max(16 * 1024 * 1024, 2 * vmem_need)))

    def const(shape):
        n = len(shape)
        return pl.BlockSpec(shape, lambda b, _n=n: (0,) * _n)

    return pl.pallas_call(
        _block_pool_kernel,
        out_shape=jax.ShapeDtypeStruct((N, 1, C), jnp.float32),
        grid=(N,),
        in_specs=[pl.BlockSpec((1, Ho, Wo, C), lambda b: (b, 0, 0, 0)),
                  const((9, C, C)), const((1, C)), const((1, C)),
                  const((9, C, C)), const((1, C)), const((1, C))],
        out_specs=pl.BlockSpec((1, 1, C), lambda b: (b, 0, 0)),
        scratch_shapes=[pltpu.VMEM((Hp, Wp8, C), jnp.bfloat16),
                        pltpu.VMEM((Hp, Wp8, C), jnp.bfloat16)],
        compiler_params=pltpu.CompilerParams(
            dimension_semantics=("parallel",),
            vmem_limit_bytes=vmem_limit),
        cost_estimate=pl.CostEstimate(flops=flops, transcendentals=0,
                                      bytes_accessed=bytes_accessed),
    )(y0, w1, s1, b1, w2, s2, b2)


def final_fc(pooled, fc_w, fc_b):
    """Replaced final nn.Linear, batched over N (single-block pallas_call)."""
    N, C = pooled.shape
    ncls = fc_w.shape[1]
    return pl.pallas_call(
        _fc_kernel,
        out_shape=jax.ShapeDtypeStruct((N, ncls), jnp.float32),
        grid=(1,),
        in_specs=[pl.BlockSpec((N, C), lambda i: (0, 0)),
                  pl.BlockSpec((C, ncls), lambda i: (0, 0)),
                  pl.BlockSpec((1, ncls), lambda i: (0, 0))],
        out_specs=pl.BlockSpec((N, ncls), lambda i: (0, 0)),
    )(pooled, fc_w, fc_b)


# --------------------------------- glue -------------------------------------

def im2col(x_nhwc, kh, kw, stride, pad):
    """Extract conv patches.  Returns ([N*Ho*Wo, kh*kw*C], (N, Ho, Wo))."""
    N, H, W, C = x_nhwc.shape
    xp = jnp.pad(x_nhwc, ((0, 0), (pad, pad), (pad, pad), (0, 0)))
    Ho = (H + 2 * pad - kh) // stride + 1
    Wo = (W + 2 * pad - kw) // stride + 1
    cols = []
    for i in range(kh):
        for j in range(kw):
            cols.append(xp[:, i:i + stride * Ho:stride,
                           j:j + stride * Wo:stride, :])
    patches = jnp.stack(cols, axis=3)                     # [N, Ho, Wo, kh*kw, C]
    return patches.reshape(N * Ho * Wo, kh * kw * C), (N, Ho, Wo)


def init_params(key, cin=3, c0=16, num_classes=10):
    ks = jax.random.split(key, 8)

    def bn(k, c):
        return (1.0 + 0.1 * jax.random.normal(k, (c,), jnp.float32),
                0.05 * jax.random.normal(jax.random.fold_in(k, 1), (c,), jnp.float32),
                0.1 * jax.random.normal(jax.random.fold_in(k, 2), (c,), jnp.float32),
                jnp.abs(1.0 + 0.1 * jax.random.normal(jax.random.fold_in(k, 3),
                                                      (c,), jnp.float32)))

    return {
        "w0": 0.1 * jax.random.normal(ks[0], (3 * 3 * cin, c0), jnp.float32),
        "bn0": bn(ks[1], c0),
        "w1": 0.1 * jax.random.normal(ks[2], (9, c0, c0), jnp.float32),
        "bn1": bn(ks[3], c0),
        "w2": 0.1 * jax.random.normal(ks[4], (9, c0, c0), jnp.float32),
        "bn2": bn(ks[5], c0),
        "fc_w": 0.1 * jax.random.normal(ks[6], (c0, num_classes), jnp.float32),
        "fc_b": 0.01 * jax.random.normal(ks[7], (num_classes,), jnp.float32),
    }


def prepare_params(params):
    """Fold BN, zero-pad channel/class lanes to multiples of 128, cast conv matmul
    operands to bf16.  Zero padding is benign: padded weight rows/cols and padded
    BN scales/shifts are zero, so padded channels stay exactly zero through every
    layer and padded logit columns are sliced off outside the kernels.
    NOTE: the stem K (=27) is intentionally NOT padded (full-extent K block)."""
    c0 = params["w0"].shape[1]
    ncls = params["fc_w"].shape[1]
    k0 = params["w0"].shape[0]
    c0p = _round_up(c0, LANE)
    nclsp = _round_up(ncls, LANE)

    def fold(bn_tuple, eps=1e-5):
        g, b, m, v = bn_tuple
        scale = g / jnp.sqrt(v + eps)
        return scale, b - m * scale

    def pad_sc(scale, shift):
        return (jnp.zeros((1, c0p), jnp.float32).at[0, :c0].set(scale),
                jnp.zeros((1, c0p), jnp.float32).at[0, :c0].set(shift))

    s0, sh0 = pad_sc(*fold(params["bn0"]))
    s1, sh1 = pad_sc(*fold(params["bn1"]))
    s2, sh2 = pad_sc(*fold(params["bn2"]))

    w0 = jnp.zeros((k0, c0p), jnp.bfloat16).at[:, :c0].set(
        params["w0"].astype(jnp.bfloat16))
    w1 = jnp.zeros((9, c0p, c0p), jnp.bfloat16).at[:, :c0, :c0].set(
        params["w1"].astype(jnp.bfloat16))
    w2 = jnp.zeros((9, c0p, c0p), jnp.bfloat16).at[:, :c0, :c0].set(
        params["w2"].astype(jnp.bfloat16))
    fc_w = jnp.zeros((c0p, nclsp), jnp.float32).at[:c0, :ncls].set(params["fc_w"])
    fc_b = jnp.zeros((1, nclsp), jnp.float32).at[0, :ncls].set(params["fc_b"])

    return dict(w0=w0, s0=s0, sh0=sh0, w1=w1, s1=s1, sh1=sh1,
                w2=w2, s2=s2, sh2=sh2, fc_w=fc_w, fc_b=fc_b)


def torchvision_model_forward(x_nchw, prep, num_classes, *, tm=256):
    # layout: NCHW (PyTorch) in, NHWC internally, logits [N, num_classes] out.
    x = jnp.transpose(x_nchw, (0, 2, 3, 1)).astype(jnp.float32)       # NHWC

    # ---- stem: conv3x3 / stride 2 + BN + ReLU (im2col -> tiled MXU matmul) ----
    p, (N, Ho, Wo) = im2col(x, 3, 3, stride=2, pad=1)                 # (M, 27)
    y0 = conv_bn_relu(p.astype(jnp.bfloat16), prep["w0"], prep["s0"], prep["sh0"],
                      tm=tm)                                          # (M, C0p) bf16
    c0p = y0.shape[1]
    y0 = y0.reshape(N, Ho, Wo, c0p)

    # ---- fused BasicBlock + global-avg-pool (halo handled inside the kernel) ----
    pooled = basic_block_pool(
        y0, prep["w1"], prep["s1"], prep["sh1"],
        prep["w2"], prep["s2"], prep["sh2"])                          # (N, 1, C0p)

    # ---- replaced final Linear, batched over N -------------------------------
    logits_p = final_fc(pooled.reshape(N, c0p), prep["fc_w"], prep["fc_b"])
    return logits_p[:, :num_classes]


if __name__ == "__main__":
    key = jax.random.PRNGKey(0)
    k_x, k_p = jax.random.split(key)
    x = jax.random.normal(k_x, (2, 3, 16, 16), jnp.float32)           # NCHW, like torch
    raw_params = init_params(k_p, cin=3, c0=16, num_classes=10)
    prep = prepare_params(raw_params)

    logits = torchvision_model_forward(x, prep, num_classes=10)
    jax.block_until_ready(logits)
    assert logits.shape == (2, 10) and logits.dtype == jnp.float32
    print("KERNEL_OK")
</pallas_src>

<mosaic_0001>
module attributes {stable_mosaic.version = 11 : i64} {
  func.func @_conv_bn_relu_kernel(%arg0: i32, %arg1: memref<128x27xbf16, #tpu.memory_space<vmem>>, %arg2: memref<27x128xbf16, #tpu.memory_space<vmem>>, %arg3: memref<1x128xf32, #tpu.memory_space<vmem>>, %arg4: memref<1x128xf32, #tpu.memory_space<vmem>>, %arg5: memref<128x128xbf16, #tpu.memory_space<vmem>>) attributes {dimension_semantics = [#tpu.dimension_semantics<parallel>], iteration_bounds = array<i64: 1>, scalar_prefetch = 0 : i64, scratch_operands = 0 : i64, tpu.core_type = #tpu.core_type<tc>, window_params = [{transform_indices = @transform_0, window_bounds = array<i64: 128, 27>}, {pipeline_mode = #tpu.pipeline_mode<synchronous>, transform_indices = @transform_1, window_bounds = array<i64: 27, 128>}, {pipeline_mode = #tpu.pipeline_mode<synchronous>, transform_indices = @transform_2, window_bounds = array<i64: 1, 128>}, {pipeline_mode = #tpu.pipeline_mode<synchronous>, transform_indices = @transform_3, window_bounds = array<i64: 1, 128>}, {transform_indices = @transform_4, window_bounds = array<i64: 128, 128>}]} {
    %c0 = arith.constant 0 : index
    %c0_0 = arith.constant 0 : index
    %0 = vector.load %arg1[%c0, %c0_0] : memref<128x27xbf16, #tpu.memory_space<vmem>>, vector<128x27xbf16>
    %c0_1 = arith.constant 0 : index
    %c0_2 = arith.constant 0 : index
    %1 = vector.load %arg2[%c0_1, %c0_2] : memref<27x128xbf16, #tpu.memory_space<vmem>>, vector<27x128xbf16>
    %cst = arith.constant dense<0.000000e+00> : vector<128x128xf32>
    %2 = tpu.matmul %0, %1, %cst {dimension_numbers = #tpu.dot_dimension_numbers<[1], [0], [0], [1], [0, 0, 1, 1], [], []>} : vector<128x27xbf16>, vector<27x128xbf16>, vector<128x128xf32> -> vector<128x128xf32>
    %c0_3 = arith.constant 0 : index
    %c0_4 = arith.constant 0 : index
    %3 = vector.load %arg3[%c0_3, %c0_4] : memref<1x128xf32, #tpu.memory_space<vmem>>, vector<1x128xf32>
    %4 = vector.broadcast %3 : vector<1x128xf32> to vector<128x128xf32>
    %5 = arith.mulf %2, %4 : vector<128x128xf32>
    %c0_5 = arith.constant 0 : index
    %c0_6 = arith.constant 0 : index
    %6 = vector.load %arg4[%c0_5, %c0_6] : memref<1x128xf32, #tpu.memory_space<vmem>>, vector<1x128xf32>
    %7 = vector.broadcast %6 : vector<1x128xf32> to vector<128x128xf32>
    %8 = arith.addf %5, %7 : vector<128x128xf32>
    %cst_7 = arith.constant 0.000000e+00 : f32
    %9 = vector.broadcast %cst_7 : f32 to vector<128x128xf32>
    %10 = arith.maximumf %8, %9 : vector<128x128xf32>
    %11 = arith.truncf %10 : vector<128x128xf32> to vector<128x128xbf16>
    %c0_8 = arith.constant 0 : index
    %c0_9 = arith.constant 0 : index
    %12 = vector.load %arg5[%c0_8, %c0_9] : memref<128x128xbf16, #tpu.memory_space<vmem>>, vector<128x128xbf16>
    tpu.vector_store %arg5[%c0_8, %c0_9], %11 {strides = array<i32>} : memref<128x128xbf16, #tpu.memory_space<vmem>>, vector<128x128xbf16>,
    return
  }
  func.func @transform_0(%arg0: i32) -> (i32, i32) {
    %c0_i32 = arith.constant 0 : i32
    %c0_i32_0 = arith.constant 0 : i32
    return %arg0, %c0_i32 : i32, i32
  }
  func.func @transform_1(%arg0: i32) -> (i32, i32) {
    %c0_i32 = arith.constant 0 : i32
    %c0_i32_0 = arith.constant 0 : i32
    %c0_i32_1 = arith.constant 0 : i32
    return %c0_i32, %c0_i32_0 : i32, i32
  }
  func.func @transform_2(%arg0: i32) -> (i32, i32) {
    %c0_i32 = arith.constant 0 : i32
    %c0_i32_0 = arith.constant 0 : i32
    %c0_i32_1 = arith.constant 0 : i32
    return %c0_i32, %c0_i32_0 : i32, i32
  }
  func.func @transform_3(%arg0: i32) -> (i32, i32) {
    %c0_i32 = arith.constant 0 : i32
    %c0_i32_0 = arith.constant 0 : i32
    %c0_i32_1 = arith.constant 0 : i32
    return %c0_i32, %c0_i32_0 : i32, i32
  }
  func.func @transform_4(%arg0: i32) -> (i32, i32) {
    %c0_i32 = arith.constant 0 : i32
    %c0_i32_0 = arith.constant 0 : i32
    return %arg0, %c0_i32 : i32, i32
  }
}

</mosaic_0001>

<bundles_post_ra>
// kernel: tpu_custom_call.1
= control target key start
LH: loop header
LB: loop body
LE: loop exit
PB: predicated region body
PF: predicated region fallthrough
CT: control target
= control target key end

     0   :  { %vm115_vm0 = vcmask 1044480   ;;  %vm116_vm1 = vcmask 1045504   ;;  %v548_v2 = vmov 65535   ;;  %vm90_vm2 = vcmask 220160   ;;  %s651_s0 = inlined_call_operand.vmem [shape: bf16[128,27], index: 0, kind: input, shape index: {}]   ;;  %s652_s1 = inlined_call_operand.vmem [shape: bf16[27,128], index: 1, kind: input, shape index: {}]   ;;  %s653_s2 = inlined_call_operand.vmem [shape: f32[1,128], index: 2, kind: input, shape index: {}]   ;;  %s654_s3 = inlined_call_operand.vmem [shape: f32[1,128], index: 3, kind: input, shape index: {}]   ;;  %s655_s4 = inlined_call_operand.hbm [shape: bf16[128,128], index: 4, kind: output, shape index: {}]  }
   0x1   :  { %v514_v0 = vld [vmem:[%s652_s1] sm:$0xff]   ;;  %v515_v1 = vld [vmem:[%s652_s1 + $0x8] sm:$0x3f]   ;;  %v117_v3 = vsel %vm115_vm0, 4294967295, %v548_v2  ;;  %v520_v10 = vld [vmem:[%s651_s0 + $0x10] sm:$0xff]  }
   0x2   :  { %486 = vmatprep.subr.bf16.mxu0 %v514_v0  ;;  %506 = vmatprep.subr.bf16.mxu1 %v514_v0  ;;  %v516_v4 = vld [vmem:[%s651_s0] sm:$0xff]   ;;  %v118_v6 = vsel %vm116_vm1, %v117_v3, 0  ;;  %v518_v8 = vld [vmem:[%s651_s0 + $0x8] sm:$0xff]   ;;  %v521_v11 = vld [vmem:[%s651_s0 + $0x30] sm:$0xff]  }
   0x3   :  { %487 = vmatpush3.bf16.msra.mxu0 %v514_v0  ;;  %508 = vmatpush3.bf16.msra.mxu1 %v514_v0  ;;  %v517_v5 = vld [vmem:[%s651_s0 + $0x20] sm:$0xff]   ;;  %v120_v7 = vand.u32 %v515_v1, %v118_v6  ;;  %v519_v9 = vld [vmem:[%s651_s0 + $0x28] sm:$0xff]  }
   0x4   :  { %490 = vmatprep.mubr.msk.bf16.mxu0 %vm90_vm2, %v516_v4  ;;  %498 = vmatprep.mubr.msk.bf16.mxu1 %vm90_vm2, %v517_v5 }
   0x5   :  { %488 = vmatprep.subr.bf16.mxu0 %v120_v7  ;;  %507 = vmatprep.subr.bf16.mxu1 %v120_v7 }
   0x7   :  { %489 = vmatpush3.bf16.msra.mxu0 %v120_v7  ;;  %509 = vmatpush3.bf16.msra.mxu1 %v120_v7 }
   0x8   :  { %9 = vsyncpa [#allocation3], 0  ;;  %v522_v12 = vld [vmem:[%s651_s0 + $0x18] sm:$0xff]   ;;  %v395_v14 = vld [vmem:[%s653_s2] ss:$0 sm:$0xff] }
   0x9   :  { %v523_v13 = vld [vmem:[%s651_s0 + $0x38] sm:$0xff]   ;;  %v621_v16 = vld [vmem:[%s654_s3] ss:$0 sm:$0xff]  ;;  %s549_s0 = smov [#allocation2]  }
   0xa   :  { %491 = vmatmul.mubr.msk.bf16.vlgmr.msra.gmra.mrb[0].mxu0 %vm90_vm2, %v518_v8  ;;  %499 = vmatmul.mubr.msk.bf16.vlgmr.msra.gmra.mrb[0].mxu1 %vm90_vm2, %v519_v9  ;;  %s366_s2 = sshll.u32 %s549_s0, 4  ;;  %s367_s2 = int_to_ptr.vmem [resolvable:$true] %s366_s2 }
   0xb   :  { %494 = vmatprep.mubr.msk.bf16.mxu0 %vm90_vm2, %v520_v10  ;;  %502 = vmatprep.mubr.msk.bf16.mxu1 %vm90_vm2, %v521_v11  ;;  %s524_s3 = scalar_lea.vmem %s367_s2, 1024  ;;  %p529_p1 = scmp.lt.s32.totalorder %s367_s2, %s367_s2 }
   0xc   :  { %p525_p0 = scmp.ne.s32.totalorder %s367_s2, %s524_s3  ;;  %p530_p2 = scmp.lt.s32.totalorder %s524_s3, %s524_s3 }
   0xe   :  { %p531_p3 = por %p530_p2, %p529_p1 }
  0x10   :  { %p532_p4 = pnand %p531_p3, %p525_p0 }
  0x12   :  { %495 = vmatmul.mubr.msk.bf16.gmra.mrb[4].mxu0 %vm90_vm2, %v522_v12  ;;  %503 = vmatmul.mubr.msk.bf16.gmra.mrb[4].mxu1 %vm90_vm2, %v523_v13 }
  0xdd   :  { %v492_v15 = vpop.f32.mrb[0].mxu0  ;;  %v500_v17 = vpop.f32.mrb[0].mxu1 }
  0xde   :  { %v228_v18 = vmul.f32 %v492_v15, %v395_v14  ;;  %v236_v19 = vmul.f32 %v500_v17, %v395_v14  ;;  %v156_v20 = vpop.f32.mrb[1].mxu0  ;;  %v188_v21 = vpop.f32.mrb[1].mxu1 }
  0xdf   :  { %v226_v22 = vmul.f32 %v395_v14, %v156_v20  ;;  %v234_v23 = vmul.f32 %v395_v14, %v188_v21  ;;  %v493_v24 = vpop.f32.mrb[2].mxu0  ;;  %v501_v25 = vpop.f32.mrb[2].mxu1 }
  0xe0   :  { %v251_v26 = vadd.f32 %v621_v16, %v228_v18  ;;  %v259_v27 = vadd.f32 %v621_v16, %v236_v19  ;;  %v229_v28 = vmul.f32 %v493_v24, %v395_v14  ;;  %v237_v29 = vmul.f32 %v501_v25, %v395_v14  ;;  %v159_v30 = vpop.f32.mrb[3].mxu0  ;;  %v191_v31 = vpop.f32.mrb[3].mxu1 }
  0xe1   :  { %v249_v32 = vadd.f32 %v621_v16, %v226_v22  ;;  %v257_v33 = vadd.f32 %v621_v16, %v234_v23  ;;  %v227_v34 = vmul.f32 %v395_v14, %v159_v30  ;;  %v235_v35 = vmul.f32 %v395_v14, %v191_v31 }
  0xe2   :  { %v252_v36 = vadd.f32 %v621_v16, %v229_v28  ;;  %v260_v37 = vadd.f32 %v621_v16, %v237_v29  ;;  %v267_v40 = vmax.f32 %v251_v26, 0.0  ;;  %v275_v41 = vmax.f32 %v259_v27, 0.0 }
  0xe3   :  { %v250_v38 = vadd.f32 %v621_v16, %v227_v34  ;;  %v258_v39 = vadd.f32 %v621_v16, %v235_v35  ;;  %v265_v44 = vmax.f32 %v249_v32, 0.0  ;;  %v273_v45 = vmax.f32 %v257_v33, 0.0 }
  0xe4   :  { %v268_v42 = vmax.f32 %v252_v36, 0.0  ;;  %v276_v43 = vmax.f32 %v260_v37, 0.0 }
  0xe5   :  { %v266_v46 = vmax.f32 %v250_v38, 0.0  ;;  %v274_v47 = vmax.f32 %v258_v39, 0.0  ;;  %v496_v48 = vpop.f32.mrb[4].mxu0  ;;  %v504_v49 = vpop.f32.mrb[4].mxu1 }
  0xe6   :  { %v437_v50 = vpack.c.bf16 %v268_v42, %v267_v40  ;;  %v457_v51 = vpack.c.bf16 %v276_v43, %v275_v41  ;;  %v232_v52 = vmul.f32 %v496_v48, %v395_v14  ;;  %v240_v53 = vmul.f32 %v504_v49, %v395_v14  ;;  %v172_v54 = vpop.f32.mrb[5].mxu0  ;;  %v204_v55 = vpop.f32.mrb[5].mxu1 }
  0xe7   :  { %v432_v56 = vpack.c.bf16 %v266_v46, %v265_v44  ;;  %v452_v57 = vpack.c.bf16 %v274_v47, %v273_v45  ;;  %v230_v58 = vmul.f32 %v395_v14, %v172_v54  ;;  %v238_v59 = vmul.f32 %v395_v14, %v204_v55  ;;  %v497_v60 = vpop.f32.mrb[6].mxu0  ;;  %v505_v61 = vpop.f32.mrb[6].mxu1 }
  0xe8   :  { %469 = vst [vmem:[#allocation2 + $0x8] sm:$0xff] %v437_v50   ;;  %473 = vst [vmem:[#allocation2 + $0x28] sm:$0xff] %v457_v51   ;;  %v255_v62 = vadd.f32 %v621_v16, %v232_v52  ;;  %v263_v63 = vadd.f32 %v621_v16, %v240_v53  ;;  %v233_v0 = vmul.f32 %v497_v60, %v395_v14  ;;  %v175_v2 = vpop.f32.mrb[7].mxu0  ;;  %v207_v3 = vpop.f32.mrb[7].mxu1 }
  0xe9   :  { %v241_v1 = vmul.f32 %v505_v61, %v395_v14  ;;  %433 = vst [vmem:[#allocation2] sm:$0xff] %v432_v56   ;;  %472 = vst [vmem:[#allocation2 + $0x20] sm:$0xff] %v452_v57   ;;  %v253_v4 = vadd.f32 %v621_v16, %v230_v58  ;;  %v261_v5 = vadd.f32 %v621_v16, %v238_v59 }
  0xea   :  { %v231_v6 = vmul.f32 %v395_v14, %v175_v2  ;;  %v239_v7 = vmul.f32 %v395_v14, %v207_v3  ;;  %v256_v8 = vadd.f32 %v621_v16, %v233_v0  ;;  %v271_v12 = vmax.f32 %v255_v62, 0.0 }
  0xeb   :  { %v264_v9 = vadd.f32 %v621_v16, %v241_v1  ;;  %v279_v13 = vmax.f32 %v263_v63, 0.0  ;;  %v269_v18 = vmax.f32 %v253_v4, 0.0  ;;  %v277_v19 = vmax.f32 %v261_v5, 0.0 }
  0xec   :  { %v254_v10 = vadd.f32 %v621_v16, %v231_v6  ;;  %v262_v11 = vadd.f32 %v621_v16, %v239_v7  ;;  %v272_v15 = vmax.f32 %v256_v8, 0.0 }
  0xed   :  { %v280_v17 = vmax.f32 %v264_v9, 0.0 }
  0xee   :  { %v270_v20 = vmax.f32 %v254_v10, 0.0  ;;  %v278_v21 = vmax.f32 %v262_v11, 0.0  ;;  %v447_v22 = vpack.c.bf16 %v272_v15, %v271_v12 }
  0xef   :  { %v467_v14 = vpack.c.bf16 %v280_v17, %v279_v13 }
  0xf0   :  { %v442_v23 = vpack.c.bf16 %v270_v20, %v269_v18  ;;  %v462_v24 = vpack.c.bf16 %v278_v21, %v277_v19  ;;  %471 = vst [vmem:[#allocation2 + $0x18] sm:$0xff] %v447_v22  }
  0xf1   :  { %475 = vst [vmem:[#allocation2 + $0x38] sm:$0xff] %v467_v14  }
  0xf2   :  { %470 = vst [vmem:[#allocation2 + $0x10] sm:$0xff] %v442_v23   ;;  %474 = vst [vmem:[#allocation2 + $0x30] sm:$0xff] %v462_v24  }
  0xf3   :  { %535 = shalt.err (!%p532_p4)
}
  0xf4   :  { %s536_s14 = scalar_lea.hbm %s655_s4, 1024 }
  0xf5   :  { %p537_p5 = scmp.ne.s32.totalorder %s655_s4, %s536_s14  ;;  %p540_p6 = scmp.lt.u32.totalorder %s536_s14, %s655_s4 }
  0xf7   :  { %p542_p7 = pnand %p540_p6, %p537_p5 }
  0xf9   :  { %545 = shalt.err (!%p542_p7)
}
  0xfa   :  { %s550_s19 = smov 64   ;;  %s551_s20 = smov 4  }
  0xfb   :  { %372 = dma.vmem_to_hbm [thread:$0]  %s367_s2, 1024, %s655_s4, [#allocation3], %s550_s19, %s550_s19, %s551_s20  }
  0xfc   :  { %546 = dma.done.wait [#allocation3], 1024  }
  0xfd   :  { %547 = vsyncadd [#allocation3], 4294966272 }
  0xfe   :  { %376 = vsyncpa [#allocation3], 1 }

</bundles_post_ra>
